<compile_context>
chip_gen: v5e
topology: v5e:2x2
jax: 0.10.0
libtpu: 0.0.40
codegen_flags: <defaults>
</compile_context>

<pallas_src>
import functools

import jax
import jax.numpy as jnp
from jax import lax
from jax.experimental import pallas as pl
from jax.experimental.pallas import tpu as pltpu


def _res_bottleneck_kernel(
    x_ref,                      # (Cin, Np)   lane-dense, Np = pad128(B*L)
    ones_ref,                   # (Np, 1)     1.0 on valid columns, 0.0 on pad
    mask_ref,                   # (K, Np)     per-tap validity masks (f32)
    w1_ref, b1_ref,             # (Chid, Cin), (Chid, 1)
    w2s_ref, b2_ref,            # (Chid, K*Chid), (Chid, 1)  tap-stacked conv2
    w3_ref, b3_ref,             # (Cin, Chid), (Cin, 1)
    g1_ref, be1_ref,            # (Chid, 1) each
    g2_ref, be2_ref,            # (Chid, 1) each
    g3_ref, be3_ref,            # (Cin, 1) each
    out_ref,                    # (Cin, Np)
    slab_ref,                   # VMEM scratch (K*Chid, Np): stacked conv2 taps
    *, n_valid, K, dilation, padding, eps,
):
  Cin, Np = x_ref.shape
  Chid = w1_ref.shape[0]
  inv_n = 1.0 / float(n_valid)

  def leaky(v):
    # LeakyReLU(0.2): max(v, 0.2*v)
    return jnp.maximum(v, 0.2 * v)

  ones_col = ones_ref[...]                            # (Np, 1)

  def bn_scale_shift(v, g, be):
    # Training-mode BN stats per channel (biased variance, eps), in f32.
    # Row sums / sum-of-squares go through the MXU (dot with the valid-column
    # ones vector) instead of XLU cross-lane reductions; lane-padding columns
    # contribute exactly zero.
    s = jnp.dot(v, ones_col, preferred_element_type=jnp.float32)        # (C,1)
    ss = jnp.dot(v * v, ones_col, preferred_element_type=jnp.float32)   # (C,1)
    mean = s * inv_n
    var = ss * inv_n - mean * mean
    # TODO(synk): switch to a centered two-pass variance if activations become
    #             large-mean (E[x^2]-mean^2 can cancel in f32).
    scale = g * lax.rsqrt(var + eps)
    shift = be - mean * scale
    return scale, shift

  x = x_ref[...]                                      # (Cin, Np)

  # ---- conv1 (1x1) + LeakyReLU + BN1 ---------------------------------------
  h1 = leaky(jnp.dot(w1_ref[...], x, preferred_element_type=jnp.float32)
             + b1_ref[...])                           # (Chid, Np)
  scale1, shift1 = bn_scale_shift(h1, g1_ref[...], be1_ref[...])
  bn1 = h1 * scale1 + shift1                          # (Chid, Np)

  # ---- conv2 (kernel K, dilation, zero padding): one deep MXU matmul -------
  # Tap t reads bn1 shifted by d = t*dilation - padding along the merged lane
  # axis; out-of-range / cross-batch / pad columns are zeroed by a precomputed
  # f32 mask (multiply, not select).  All K shifted slabs are written into one
  # (K*Chid, Np) scratch so conv2 is a single matmul with contraction depth
  # K*Chid instead of K shallow matmuls plus K-1 full-width VPU adds.
  for t in range(K):
    d = t * dilation - padding
    rolled = bn1 if d == 0 else pltpu.roll(bn1, shift=(-d) % Np, axis=1)
    slab_ref[t * Chid:(t + 1) * Chid, :] = rolled * mask_ref[t:t + 1, :]
  h2 = leaky(jnp.dot(w2s_ref[...], slab_ref[...],
                     preferred_element_type=jnp.float32)
             + b2_ref[...])                           # (Chid, Np)
  scale2, shift2 = bn_scale_shift(h2, g2_ref[...], be2_ref[...])

  # ---- conv3 (1x1) with BN2 folded into weight / bias ----------------------
  # conv3(bn2) = (W3 * scale2^T) @ h2 + (W3 @ shift2 + b3):
  #  * scaling the small (Cin, Chid) weight replaces a (Chid, Np) VPU multiply,
  #  * W3 @ shift2 (a 1-lane MXU matmul) becomes a tiny VPU row-sum.
  scale2_row = jnp.transpose(scale2)                  # (1, Chid)
  shift2_row = jnp.transpose(shift2)                  # (1, Chid)
  w3 = w3_ref[...]
  w3s = w3 * scale2_row                               # (Cin, Chid)
  b3f = (jnp.sum(w3 * shift2_row, axis=1, keepdims=True)
         + b3_ref[...])                               # (Cin, 1)
  h3 = leaky(jnp.dot(w3s, h2, preferred_element_type=jnp.float32) + b3f)
  scale3, shift3 = bn_scale_shift(h3, g3_ref[...], be3_ref[...])

  # ---- BN3 + residual add + ReLU, written straight to the output -----------
  out_ref[...] = jnp.maximum(h3 * scale3 + shift3 + x, 0.0).astype(out_ref.dtype)


def _vmem_capacity_bytes():
  """Physical VMEM of the current generation (64 MiB/TC v7x, 128 MiB v5e/v6e)."""
  try:
    info = pltpu.get_tpu_info()
    cap = getattr(info, "vmem_capacity_bytes", None)
    if cap:
      return int(cap)
  except Exception:
    pass
  return 64 << 20   # conservative fallback (v7x per-TensorCore VMEM)


def res_bottleneck_lanes(x2, params, *, L, kernel_size, dilation):
  """Bottleneck block on a lane-dense (Cin, B*L) activation slab.

  Chain this entry point across consecutive blocks to keep activations in the
  (C, B*L) layout and avoid per-block HBM transpose round-trips.
  """
  Cin, N = x2.shape
  Chid = params["w1"].shape[0]
  K = kernel_size
  padding = (K - 1) // 2 * dilation

  # Pad the lane extent to a multiple of 128 (unmasked stores, cheap rotates).
  Np = ((N + 127) // 128) * 128
  x2p = x2 if Np == N else jnp.pad(x2, ((0, 0), (0, Np - N)))

  # Valid-column ones vector (BN sums via MXU, excludes padding) and per-tap
  # f32 validity masks (zero the out-of-range / cross-batch / pad columns).
  col = jnp.arange(Np)
  valid = col < N
  ones_col = valid.astype(jnp.float32).reshape(Np, 1)
  pos = col % L
  mask = jnp.stack(
      [(valid
        & (pos + (t * dilation - padding) >= 0)
        & (pos + (t * dilation - padding) < L)).astype(jnp.float32)
       for t in range(K)], axis=0)                    # (K, Np)

  # conv2 weight stored as (K, Cout, Cin); stack taps along the contraction
  # axis -> (Cout, K*Cin) so conv2 becomes a single deep matmul.
  w2s = jnp.transpose(params["w2k"], (1, 0, 2)).reshape(Chid, K * Chid)

  kernel = functools.partial(
      _res_bottleneck_kernel, n_valid=N, K=K,
      dilation=dilation, padding=padding, eps=1e-5)

  args = (
      x2p, ones_col, mask,
      params["w1"], params["b1"].reshape(Chid, 1),
      w2s, params["b2"].reshape(Chid, 1),
      params["w3"], params["b3"].reshape(Cin, 1),
      params["g1"].reshape(Chid, 1), params["be1"].reshape(Chid, 1),
      params["g2"].reshape(Chid, 1), params["be2"].reshape(Chid, 1),
      params["g3"].reshape(Cin, 1), params["be3"].reshape(Cin, 1),
  )

  # Working-set estimate: x/out + live (Chid, Np) slabs + tap-stack scratch +
  # weights/masks.  Ceiling derived from the actual chip generation instead of
  # a hard 32 MiB clamp (v6e/v5e have 128 MiB physical, v7x only 64 MiB).
  f32 = 4
  act_bytes = f32 * Np * (2 * Cin + 3 * Chid + K * Chid)
  w_bytes = f32 * (2 * Chid * Cin + K * Chid * Chid
                   + (K + 1) * Np + 8 * Chid + 4 * Cin)
  need = act_bytes + w_bytes
  vmem_cap = _vmem_capacity_bytes()
  vmem_limit = int(min(max(2 * need, 8 << 20), int(0.8 * vmem_cap)))
  # TODO(synk): if `need` exceeds the per-generation budget, fall back to an
  #             N-tiled grid with a two-pass BN (also enables megacore).

  cost = pl.CostEstimate(
      flops=int(2 * Np * (Chid * Cin + K * Chid * Chid + Cin * Chid)
                + 4 * Np * (2 * Chid + Cin)),
      transcendentals=int(2 * Chid + Cin),
      bytes_accessed=int(f32 * (2 * Cin * Np + (K + 1) * Np
                                + 2 * Chid * Cin + K * Chid * Chid
                                + 8 * Chid + 4 * Cin)),
  )

  out2p = pl.pallas_call(
      kernel,
      out_shape=jax.ShapeDtypeStruct((Cin, Np), x2.dtype),
      in_specs=[pl.BlockSpec(memory_space=pltpu.MemorySpace.VMEM)
                for _ in args],
      out_specs=pl.BlockSpec(memory_space=pltpu.MemorySpace.VMEM),
      scratch_shapes=[pltpu.VMEM((K * Chid, Np), jnp.float32)],
      compiler_params=pltpu.CompilerParams(vmem_limit_bytes=vmem_limit),
      cost_estimate=cost,
  )(*args)

  return out2p if Np == N else out2p[:, :N]


def res_bottleneck_block(x, params, *, kernel_size, dilation):
  """(B, Cin, L) convenience wrapper around the lane-dense kernel."""
  B, Cin, L = x.shape
  x2 = jnp.transpose(x, (1, 0, 2)).reshape(Cin, B * L)
  out2 = res_bottleneck_lanes(x2, params, L=L,
                              kernel_size=kernel_size, dilation=dilation)
  return jnp.transpose(out2.reshape(Cin, B, L), (1, 0, 2))


# ---------------------------- pure-JAX reference ------------------------------
def ref_forward(x, params, *, kernel_size, dilation):
  padding = (kernel_size - 1) // 2 * dilation
  leaky = lambda v: jnp.maximum(v, 0.2 * v)

  def conv1x1(v, w, b):
    return jnp.einsum("oc,bcl->bol", w, v) + b[None, :, None]

  def bn(v, g, be):
    m = v.mean(axis=(0, 2), keepdims=True)
    var = ((v - m) ** 2).mean(axis=(0, 2), keepdims=True)
    return (v - m) * lax.rsqrt(var + 1e-5) * g[None, :, None] + be[None, :, None]

  h = bn(leaky(conv1x1(x, params["w1"], params["b1"])), params["g1"], params["be1"])
  w2_oik = jnp.transpose(params["w2k"], (1, 2, 0))     # (O, I, K)
  h2 = lax.conv_general_dilated(
      h, w2_oik, window_strides=(1,), padding=[(padding, padding)],
      rhs_dilation=(dilation,), dimension_numbers=("NCH", "OIH", "NCH"))
  h2 = h2 + params["b2"][None, :, None]
  h2 = bn(leaky(h2), params["g2"], params["be2"])
  h3 = bn(leaky(conv1x1(h2, params["w3"], params["b3"])), params["g3"], params["be3"])
  return jnp.maximum(h3 + x, 0.0)


if __name__ == "__main__":
  # Small but representative bottleneck-block shapes (block1 of ResNet19_1d
  # uses kernel_size=7, dilation=3, hidden = 2*in_channels).
  B, Cin, Chid = 2, 8, 16
  kernel_size, dilation = 7, 3

  key = jax.random.PRNGKey(0)
  ks = jax.random.split(key, 12)
  params = {
      "w1": 0.3 * jax.random.normal(ks[0], (Chid, Cin), jnp.float32),
      "b1": 0.1 * jax.random.normal(ks[1], (Chid,), jnp.float32),
      # conv2 weight stored as (K, Cout, Cin) = w_torch.transpose(2, 0, 1)
      "w2k": 0.3 * jax.random.normal(ks[2], (kernel_size, Chid, Chid), jnp.float32),
      "b2": 0.1 * jax.random.normal(ks[3], (Chid,), jnp.float32),
      "w3": 0.3 * jax.random.normal(ks[4], (Cin, Chid), jnp.float32),
      "b3": 0.1 * jax.random.normal(ks[5], (Cin,), jnp.float32),
      "g1": 1.0 + 0.1 * jax.random.normal(ks[6], (Chid,), jnp.float32),
      "be1": 0.1 * jax.random.normal(ks[7], (Chid,), jnp.float32),
      "g2": 1.0 + 0.1 * jax.random.normal(ks[8], (Chid,), jnp.float32),
      "be2": 0.1 * jax.random.normal(ks[9], (Chid,), jnp.float32),
      "g3": 1.0 + 0.1 * jax.random.normal(ks[10], (Cin,), jnp.float32),
      "be3": 0.1 * jax.random.normal(ks[11], (Cin,), jnp.float32),
  }

  # L=64 -> N=128 (lane-aligned path); L=50 -> N=100 (padded/masked path).
  for L in (64, 50):
    x = jax.random.normal(jax.random.PRNGKey(42 + L), (B, Cin, L), jnp.float32)

    out = res_bottleneck_block(x, params, kernel_size=kernel_size,
                               dilation=dilation)
    out = jax.block_until_ready(out)

    ref = jax.block_until_ready(
        ref_forward(x, params, kernel_size=kernel_size, dilation=dilation))

    assert out.shape == (B, Cin, L)
    assert jnp.allclose(out, ref, rtol=2e-3, atol=2e-4), (
        f"L={L}: max abs diff {jnp.max(jnp.abs(out - ref))}")

  print("KERNEL_OK")
</pallas_src>

<mosaic_0001>
module attributes {stable_mosaic.version = 11 : i64} {
  func.func @_res_bottleneck_kernel(%arg0: memref<8x128xf32, #tpu.memory_space<vmem>>, %arg1: memref<128x1xf32, #tpu.memory_space<vmem>>, %arg2: memref<7x128xf32, #tpu.memory_space<vmem>>, %arg3: memref<16x8xf32, #tpu.memory_space<vmem>>, %arg4: memref<16x1xf32, #tpu.memory_space<vmem>>, %arg5: memref<16x112xf32, #tpu.memory_space<vmem>>, %arg6: memref<16x1xf32, #tpu.memory_space<vmem>>, %arg7: memref<8x16xf32, #tpu.memory_space<vmem>>, %arg8: memref<8x1xf32, #tpu.memory_space<vmem>>, %arg9: memref<16x1xf32, #tpu.memory_space<vmem>>, %arg10: memref<16x1xf32, #tpu.memory_space<vmem>>, %arg11: memref<16x1xf32, #tpu.memory_space<vmem>>, %arg12: memref<16x1xf32, #tpu.memory_space<vmem>>, %arg13: memref<8x1xf32, #tpu.memory_space<vmem>>, %arg14: memref<8x1xf32, #tpu.memory_space<vmem>>, %arg15: memref<8x128xf32, #tpu.memory_space<vmem>>, %arg16: memref<112x128xf32, #tpu.memory_space<vmem>>) attributes {dimension_semantics = [], scalar_prefetch = 0 : i64, scratch_operands = 1 : i64, tpu.core_type = #tpu.core_type<tc>} {
    %c0 = arith.constant 0 : index
    %c0_0 = arith.constant 0 : index
    %0 = vector.load %arg1[%c0, %c0_0] : memref<128x1xf32, #tpu.memory_space<vmem>>, vector<128x1xf32>
    %c0_1 = arith.constant 0 : index
    %c0_2 = arith.constant 0 : index
    %1 = vector.load %arg0[%c0_1, %c0_2] : memref<8x128xf32, #tpu.memory_space<vmem>>, vector<8x128xf32>
    %c0_3 = arith.constant 0 : index
    %c0_4 = arith.constant 0 : index
    %2 = vector.load %arg3[%c0_3, %c0_4] : memref<16x8xf32, #tpu.memory_space<vmem>>, vector<16x8xf32>
    %cst = arith.constant dense<0.000000e+00> : vector<16x128xf32>
    %3 = tpu.matmul %2, %1, %cst {dimension_numbers = #tpu.dot_dimension_numbers<[1], [0], [0], [1], [0, 0, 1, 1], [], []>} : vector<16x8xf32>, vector<8x128xf32>, vector<16x128xf32> -> vector<16x128xf32>
    %c0_5 = arith.constant 0 : index
    %c0_6 = arith.constant 0 : index
    %4 = vector.load %arg4[%c0_5, %c0_6] : memref<16x1xf32, #tpu.memory_space<vmem>>, vector<16x1xf32>
    %5 = vector.broadcast %4 : vector<16x1xf32> to vector<16x128xf32>
    %6 = arith.addf %3, %5 : vector<16x128xf32>
    %cst_7 = arith.constant 2.000000e-01 : f32
    %7 = vector.broadcast %cst_7 : f32 to vector<16x128xf32>
    %8 = arith.mulf %7, %6 : vector<16x128xf32>
    %9 = arith.maximumf %6, %8 : vector<16x128xf32>
    %c0_8 = arith.constant 0 : index
    %c0_9 = arith.constant 0 : index
    %10 = vector.load %arg9[%c0_8, %c0_9] : memref<16x1xf32, #tpu.memory_space<vmem>>, vector<16x1xf32>
    %c0_10 = arith.constant 0 : index
    %c0_11 = arith.constant 0 : index
    %11 = vector.load %arg10[%c0_10, %c0_11] : memref<16x1xf32, #tpu.memory_space<vmem>>, vector<16x1xf32>
    %cst_12 = arith.constant dense<0.000000e+00> : vector<16x1xf32>
    %12 = tpu.matmul %9, %0, %cst_12 {dimension_numbers = #tpu.dot_dimension_numbers<[1], [0], [0], [1], [0, 0, 1, 1], [], []>} : vector<16x128xf32>, vector<128x1xf32>, vector<16x1xf32> -> vector<16x1xf32>
    %13 = arith.mulf %9, %9 : vector<16x128xf32>
    %cst_13 = arith.constant dense<0.000000e+00> : vector<16x1xf32>
    %14 = tpu.matmul %13, %0, %cst_13 {dimension_numbers = #tpu.dot_dimension_numbers<[1], [0], [0], [1], [0, 0, 1, 1], [], []>} : vector<16x128xf32>, vector<128x1xf32>, vector<16x1xf32> -> vector<16x1xf32>
    %cst_14 = arith.constant 7.812500e-03 : f32
    %15 = vector.broadcast %cst_14 : f32 to vector<16x1xf32>
    %16 = arith.mulf %12, %15 : vector<16x1xf32>
    %cst_15 = arith.constant 7.812500e-03 : f32
    %17 = vector.broadcast %cst_15 : f32 to vector<16x1xf32>
    %18 = arith.mulf %14, %17 : vector<16x1xf32>
    %19 = arith.mulf %16, %16 : vector<16x1xf32>
    %20 = arith.subf %18, %19 : vector<16x1xf32>
    %cst_16 = arith.constant 9.99999974E-6 : f32
    %21 = vector.broadcast %cst_16 : f32 to vector<16x1xf32>
    %22 = arith.addf %20, %21 : vector<16x1xf32>
    %23 = math.rsqrt %22 : vector<16x1xf32>
    %24 = arith.mulf %10, %23 : vector<16x1xf32>
    %25 = arith.mulf %16, %24 : vector<16x1xf32>
    %26 = arith.subf %11, %25 : vector<16x1xf32>
    %27 = vector.broadcast %24 : vector<16x1xf32> to vector<16x128xf32>
    %28 = arith.mulf %9, %27 : vector<16x128xf32>
    %29 = vector.broadcast %26 : vector<16x1xf32> to vector<16x128xf32>
    %30 = arith.addf %28, %29 : vector<16x128xf32>
    %c9_i32 = arith.constant 9 : i32
    %31 = tpu.dynamic_rotate %30 by %c9_i32 dim 1 : vector<16x128xf32>, i32 -> vector<16x128xf32>
    %c0_17 = arith.constant 0 : index
    %c0_18 = arith.constant 0 : index
    %32 = vector.load %arg2[%c0_17, %c0_18] : memref<7x128xf32, #tpu.memory_space<vmem>>, vector<1x128xf32>
    %33 = vector.broadcast %32 : vector<1x128xf32> to vector<16x128xf32>
    %34 = arith.mulf %31, %33 : vector<16x128xf32>
    %c0_19 = arith.constant 0 : index
    %c0_20 = arith.constant 0 : index
    %35 = vector.load %arg16[%c0_19, %c0_20] : memref<112x128xf32, #tpu.memory_space<vmem>>, vector<16x128xf32>
    tpu.vector_store %arg16[%c0_19, %c0_20], %34 {strides = array<i32>} : memref<112x128xf32, #tpu.memory_space<vmem>>, vector<16x128xf32>,
    %c6_i32 = arith.constant 6 : i32
    %36 = tpu.dynamic_rotate %30 by %c6_i32 dim 1 : vector<16x128xf32>, i32 -> vector<16x128xf32>
    %c1 = arith.constant 1 : index
    %c0_21 = arith.constant 0 : index
    %37 = vector.load %arg2[%c1, %c0_21] : memref<7x128xf32, #tpu.memory_space<vmem>>, vector<1x128xf32>
    %38 = vector.broadcast %37 : vector<1x128xf32> to vector<16x128xf32>
    %39 = arith.mulf %36, %38 : vector<16x128xf32>
    %c16 = arith.constant 16 : index
    %c0_22 = arith.constant 0 : index
    %40 = vector.load %arg16[%c16, %c0_22] : memref<112x128xf32, #tpu.memory_space<vmem>>, vector<16x128xf32>
    tpu.vector_store %arg16[%c16, %c0_22], %39 {strides = array<i32>} : memref<112x128xf32, #tpu.memory_space<vmem>>, vector<16x128xf32>,
    %c3_i32 = arith.constant 3 : i32
    %41 = tpu.dynamic_rotate %30 by %c3_i32 dim 1 : vector<16x128xf32>, i32 -> vector<16x128xf32>
    %c2 = arith.constant 2 : index
    %c0_23 = arith.constant 0 : index
    %42 = vector.load %arg2[%c2, %c0_23] : memref<7x128xf32, #tpu.memory_space<vmem>>, vector<1x128xf32>
    %43 = vector.broadcast %42 : vector<1x128xf32> to vector<16x128xf32>
    %44 = arith.mulf %41, %43 : vector<16x128xf32>
    %c32 = arith.constant 32 : index
    %c0_24 = arith.constant 0 : index
    %45 = vector.load %arg16[%c32, %c0_24] : memref<112x128xf32, #tpu.memory_space<vmem>>, vector<16x128xf32>
    tpu.vector_store %arg16[%c32, %c0_24], %44 {strides = array<i32>} : memref<112x128xf32, #tpu.memory_space<vmem>>, vector<16x128xf32>,
    %c3 = arith.constant 3 : index
    %c0_25 = arith.constant 0 : index
    %46 = vector.load %arg2[%c3, %c0_25] : memref<7x128xf32, #tpu.memory_space<vmem>>, vector<1x128xf32>
    %47 = vector.broadcast %46 : vector<1x128xf32> to vector<16x128xf32>
    %48 = arith.mulf %30, %47 : vector<16x128xf32>
    %c48 = arith.constant 48 : index
    %c0_26 = arith.constant 0 : index
    %49 = vector.load %arg16[%c48, %c0_26] : memref<112x128xf32, #tpu.memory_space<vmem>>, vector<16x128xf32>
    tpu.vector_store %arg16[%c48, %c0_26], %48 {strides = array<i32>} : memref<112x128xf32, #tpu.memory_space<vmem>>, vector<16x128xf32>,
    %c125_i32 = arith.constant 125 : i32
    %50 = tpu.dynamic_rotate %30 by %c125_i32 dim 1 : vector<16x128xf32>, i32 -> vector<16x128xf32>
    %c4 = arith.constant 4 : index
    %c0_27 = arith.constant 0 : index
    %51 = vector.load %arg2[%c4, %c0_27] : memref<7x128xf32, #tpu.memory_space<vmem>>, vector<1x128xf32>
    %52 = vector.broadcast %51 : vector<1x128xf32> to vector<16x128xf32>
    %53 = arith.mulf %50, %52 : vector<16x128xf32>
    %c64 = arith.constant 64 : index
    %c0_28 = arith.constant 0 : index
    %54 = vector.load %arg16[%c64, %c0_28] : memref<112x128xf32, #tpu.memory_space<vmem>>, vector<16x128xf32>
    tpu.vector_store %arg16[%c64, %c0_28], %53 {strides = array<i32>} : memref<112x128xf32, #tpu.memory_space<vmem>>, vector<16x128xf32>,
    %c122_i32 = arith.constant 122 : i32
    %55 = tpu.dynamic_rotate %30 by %c122_i32 dim 1 : vector<16x128xf32>, i32 -> vector<16x128xf32>
    %c5 = arith.constant 5 : index
    %c0_29 = arith.constant 0 : index
    %56 = vector.load %arg2[%c5, %c0_29] : memref<7x128xf32, #tpu.memory_space<vmem>>, vector<1x128xf32>
    %57 = vector.broadcast %56 : vector<1x128xf32> to vector<16x128xf32>
    %58 = arith.mulf %55, %57 : vector<16x128xf32>
    %c80 = arith.constant 80 : index
    %c0_30 = arith.constant 0 : index
    %59 = vector.load %arg16[%c80, %c0_30] : memref<112x128xf32, #tpu.memory_space<vmem>>, vector<16x128xf32>
    tpu.vector_store %arg16[%c80, %c0_30], %58 {strides = array<i32>} : memref<112x128xf32, #tpu.memory_space<vmem>>, vector<16x128xf32>,
    %c119_i32 = arith.constant 119 : i32
    %60 = tpu.dynamic_rotate %30 by %c119_i32 dim 1 : vector<16x128xf32>, i32 -> vector<16x128xf32>
    %c6 = arith.constant 6 : index
    %c0_31 = arith.constant 0 : index
    %61 = vector.load %arg2[%c6, %c0_31] : memref<7x128xf32, #tpu.memory_space<vmem>>, vector<1x128xf32>
    %62 = vector.broadcast %61 : vector<1x128xf32> to vector<16x128xf32>
    %63 = arith.mulf %60, %62 : vector<16x128xf32>
    %c96 = arith.constant 96 : index
    %c0_32 = arith.constant 0 : index
    %64 = vector.load %arg16[%c96, %c0_32] : memref<112x128xf32, #tpu.memory_space<vmem>>, vector<16x128xf32>
    tpu.vector_store %arg16[%c96, %c0_32], %63 {strides = array<i32>} : memref<112x128xf32, #tpu.memory_space<vmem>>, vector<16x128xf32>,
    %c0_33 = arith.constant 0 : index
    %c0_34 = arith.constant 0 : index
    %65 = vector.load %arg5[%c0_33, %c0_34] : memref<16x112xf32, #tpu.memory_space<vmem>>, vector<16x112xf32>
    %c0_35 = arith.constant 0 : index
    %c0_36 = arith.constant 0 : index
    %66 = vector.load %arg16[%c0_35, %c0_36] : memref<112x128xf32, #tpu.memory_space<vmem>>, vector<112x128xf32>
    %cst_37 = arith.constant dense<0.000000e+00> : vector<16x128xf32>
    %67 = tpu.matmul %65, %66, %cst_37 {dimension_numbers = #tpu.dot_dimension_numbers<[1], [0], [0], [1], [0, 0, 1, 1], [], []>} : vector<16x112xf32>, vector<112x128xf32>, vector<16x128xf32> -> vector<16x128xf32>
    %c0_38 = arith.constant 0 : index
    %c0_39 = arith.constant 0 : index
    %68 = vector.load %arg6[%c0_38, %c0_39] : memref<16x1xf32, #tpu.memory_space<vmem>>, vector<16x1xf32>
    %69 = vector.broadcast %68 : vector<16x1xf32> to vector<16x128xf32>
    %70 = arith.addf %67, %69 : vector<16x128xf32>
    %cst_40 = arith.constant 2.000000e-01 : f32
    %71 = vector.broadcast %cst_40 : f32 to vector<16x128xf32>
    %72 = arith.mulf %71, %70 : vector<16x128xf32>
    %73 = arith.maximumf %70, %72 : vector<16x128xf32>
    %c0_41 = arith.constant 0 : index
    %c0_42 = arith.constant 0 : index
    %74 = vector.load %arg11[%c0_41, %c0_42] : memref<16x1xf32, #tpu.memory_space<vmem>>, vector<16x1xf32>
    %c0_43 = arith.constant 0 : index
    %c0_44 = arith.constant 0 : index
    %75 = vector.load %arg12[%c0_43, %c0_44] : memref<16x1xf32, #tpu.memory_space<vmem>>, vector<16x1xf32>
    %cst_45 = arith.constant dense<0.000000e+00> : vector<16x1xf32>
    %76 = tpu.matmul %73, %0, %cst_45 {dimension_numbers = #tpu.dot_dimension_numbers<[1], [0], [0], [1], [0, 0, 1, 1], [], []>} : vector<16x128xf32>, vector<128x1xf32>, vector<16x1xf32> -> vector<16x1xf32>
    %77 = arith.mulf %73, %73 : vector<16x128xf32>
    %cst_46 = arith.constant dense<0.000000e+00> : vector<16x1xf32>
    %78 = tpu.matmul %77, %0, %cst_46 {dimension_numbers = #tpu.dot_dimension_numbers<[1], [0], [0], [1], [0, 0, 1, 1], [], []>} : vector<16x128xf32>, vector<128x1xf32>, vector<16x1xf32> -> vector<16x1xf32>
    %cst_47 = arith.constant 7.812500e-03 : f32
    %79 = vector.broadcast %cst_47 : f32 to vector<16x1xf32>
    %80 = arith.mulf %76, %79 : vector<16x1xf32>
    %cst_48 = arith.constant 7.812500e-03 : f32
    %81 = vector.broadcast %cst_48 : f32 to vector<16x1xf32>
    %82 = arith.mulf %78, %81 : vector<16x1xf32>
    %83 = arith.mulf %80, %80 : vector<16x1xf32>
    %84 = arith.subf %82, %83 : vector<16x1xf32>
    %cst_49 = arith.constant 9.99999974E-6 : f32
    %85 = vector.broadcast %cst_49 : f32 to vector<16x1xf32>
    %86 = arith.addf %84, %85 : vector<16x1xf32>
    %87 = math.rsqrt %86 : vector<16x1xf32>
    %88 = arith.mulf %74, %87 : vector<16x1xf32>
    %89 = arith.mulf %80, %88 : vector<16x1xf32>
    %90 = arith.subf %75, %89 : vector<16x1xf32>
    %91 = tpu.transpose %88, [1, 0] : vector<16x1xf32> -> vector<1x16xf32>
    %92 = tpu.transpose %90, [1, 0] : vector<16x1xf32> -> vector<1x16xf32>
    %c0_50 = arith.constant 0 : index
    %c0_51 = arith.constant 0 : index
    %93 = vector.load %arg7[%c0_50, %c0_51] : memref<8x16xf32, #tpu.memory_space<vmem>>, vector<8x16xf32>
    %94 = vector.broadcast %91 : vector<1x16xf32> to vector<8x16xf32>
    %95 = arith.mulf %93, %94 : vector<8x16xf32>
    %96 = vector.broadcast %92 : vector<1x16xf32> to vector<8x16xf32>
    %97 = arith.mulf %93, %96 : vector<8x16xf32>
    %cst_52 = arith.constant dense<0.000000e+00> : vector<8xf32>
    %98 = vector.multi_reduction <add>, %97, %cst_52 [1] : vector<8x16xf32> to vector<8xf32>
    %99 = vector.shape_cast %98 : vector<8xf32> to vector<8x1xf32>
    %c0_53 = arith.constant 0 : index
    %c0_54 = arith.constant 0 : index
    %100 = vector.load %arg8[%c0_53, %c0_54] : memref<8x1xf32, #tpu.memory_space<vmem>>, vector<8x1xf32>
    %101 = arith.addf %99, %100 : vector<8x1xf32>
    %cst_55 = arith.constant dense<0.000000e+00> : vector<8x128xf32>
    %102 = tpu.matmul %95, %73, %cst_55 {dimension_numbers = #tpu.dot_dimension_numbers<[1], [0], [0], [1], [0, 0, 1, 1], [], []>} : vector<8x16xf32>, vector<16x128xf32>, vector<8x128xf32> -> vector<8x128xf32>
    %103 = vector.broadcast %101 : vector<8x1xf32> to vector<8x128xf32>
    %104 = arith.addf %102, %103 : vector<8x128xf32>
    %cst_56 = arith.constant 2.000000e-01 : f32
    %105 = vector.broadcast %cst_56 : f32 to vector<8x128xf32>
    %106 = arith.mulf %105, %104 : vector<8x128xf32>
    %107 = arith.maximumf %104, %106 : vector<8x128xf32>
    %c0_57 = arith.constant 0 : index
    %c0_58 = arith.constant 0 : index
    %108 = vector.load %arg13[%c0_57, %c0_58] : memref<8x1xf32, #tpu.memory_space<vmem>>, vector<8x1xf32>
    %c0_59 = arith.constant 0 : index
    %c0_60 = arith.constant 0 : index
    %109 = vector.load %arg14[%c0_59, %c0_60] : memref<8x1xf32, #tpu.memory_space<vmem>>, vector<8x1xf32>
    %cst_61 = arith.constant dense<0.000000e+00> : vector<8x1xf32>
    %110 = tpu.matmul %107, %0, %cst_61 {dimension_numbers = #tpu.dot_dimension_numbers<[1], [0], [0], [1], [0, 0, 1, 1], [], []>} : vector<8x128xf32>, vector<128x1xf32>, vector<8x1xf32> -> vector<8x1xf32>
    %111 = arith.mulf %107, %107 : vector<8x128xf32>
    %cst_62 = arith.constant dense<0.000000e+00> : vector<8x1xf32>
    %112 = tpu.matmul %111, %0, %cst_62 {dimension_numbers = #tpu.dot_dimension_numbers<[1], [0], [0], [1], [0, 0, 1, 1], [], []>} : vector<8x128xf32>, vector<128x1xf32>, vector<8x1xf32> -> vector<8x1xf32>
    %cst_63 = arith.constant 7.812500e-03 : f32
    %113 = vector.broadcast %cst_63 : f32 to vector<8x1xf32>
    %114 = arith.mulf %110, %113 : vector<8x1xf32>
    %cst_64 = arith.constant 7.812500e-03 : f32
    %115 = vector.broadcast %cst_64 : f32 to vector<8x1xf32>
    %116 = arith.mulf %112, %115 : vector<8x1xf32>
    %117 = arith.mulf %114, %114 : vector<8x1xf32>
    %118 = arith.subf %116, %117 : vector<8x1xf32>
    %cst_65 = arith.constant 9.99999974E-6 : f32
    %119 = vector.broadcast %cst_65 : f32 to vector<8x1xf32>
    %120 = arith.addf %118, %119 : vector<8x1xf32>
    %121 = math.rsqrt %120 : vector<8x1xf32>
    %122 = arith.mulf %108, %121 : vector<8x1xf32>
    %123 = arith.mulf %114, %122 : vector<8x1xf32>
    %124 = arith.subf %109, %123 : vector<8x1xf32>
    %125 = vector.broadcast %122 : vector<8x1xf32> to vector<8x128xf32>
    %126 = arith.mulf %107, %125 : vector<8x128xf32>
    %127 = vector.broadcast %124 : vector<8x1xf32> to vector<8x128xf32>
    %128 = arith.addf %126, %127 : vector<8x128xf32>
    %129 = arith.addf %128, %1 : vector<8x128xf32>
    %cst_66 = arith.constant 0.000000e+00 : f32
    %130 = vector.broadcast %cst_66 : f32 to vector<8x128xf32>
    %131 = arith.maximumf %129, %130 : vector<8x128xf32>
    %c0_67 = arith.constant 0 : index
    %c0_68 = arith.constant 0 : index
    %132 = vector.load %arg15[%c0_67, %c0_68] : memref<8x128xf32, #tpu.memory_space<vmem>>, vector<8x128xf32>
    tpu.vector_store %arg15[%c0_67, %c0_68], %131 {strides = array<i32>} : memref<8x128xf32, #tpu.memory_space<vmem>>, vector<8x128xf32>,
    return
  }
}

</mosaic_0001>

<bundles_post_ra>
// kernel: tpu_custom_call.1
= control target key start
LH: loop header
LB: loop body
LE: loop exit
PB: predicated region body
PF: predicated region fallthrough
CT: control target
= control target key end

     0   :  { %vm82_vm0 = vcmask 64512   ;;  %v701_v3 = vmov 0   ;;  %s1064_s0 = inlined_call_operand.vmem [shape: f32[8,128], index: 0, kind: input, shape index: {}]   ;;  %s1065_s1 = inlined_call_operand.vmem [shape: f32[128,1], index: 1, kind: input, shape index: {}]   ;;  %s1066_s2 = inlined_call_operand.vmem [shape: f32[7,128], index: 2, kind: input, shape index: {}]   ;;  %s1067_s3 = inlined_call_operand.vmem [shape: f32[16,8], index: 3, kind: input, shape index: {}]   ;;  %s1068_s4 = inlined_call_operand.vmem [shape: f32[16,1], index: 4, kind: input, shape index: {}]   ;;  %s1069_s5 = inlined_call_operand.vmem [shape: f32[16,112], index: 5, kind: input, shape index: {}]   ;;  %s1070_s6 = inlined_call_operand.vmem [shape: f32[16,1], index: 6, kind: input, shape index: {}]   ;;  %s1071_s7 = inlined_call_operand.vmem [shape: f32[8,16], index: 7, kind: input, shape index: {}]   ;;  %s1072_s8 = inlined_call_operand.vmem [shape: f32[8,1], index: 8, kind: input, shape index: {}]   ;;  %s1073_s9 = inlined_call_operand.vmem [shape: f32[16,1], index: 9, kind: input, shape index: {}]   ;;  %s1074_s10 = inlined_call_operand.vmem [shape: f32[16,1], index: 10, kind: input, shape index: {}]   ;;  %s1075_s11 = inlined_call_operand.vmem [shape: f32[16,1], index: 11, kind: input, shape index: {}]   ;;  %s1076_s12 = inlined_call_operand.vmem [shape: f32[16,1], index: 12, kind: input, shape index: {}]   ;;  %s1077_s13 = inlined_call_operand.vmem [shape: f32[8,1], index: 13, kind: input, shape index: {}]   ;;  %s1078_s14 = inlined_call_operand.vmem [shape: f32[8,1], index: 14, kind: input, shape index: {}]   ;;  %s1079_s15 = inlined_call_operand.hbm [shape: f32[8,128], index: 15, kind: output, shape index: {}]  }
   0x1   :  { %v792_v0 = vld [vmem:[%s1064_s0] sm:$0xff]  ;;  %655 = vset.pattern.permute.xlu0 %v701_v3  ;;  %v804_v4 = vld [vmem:[%s1065_s1 + $0x78] sm:$0xff]  ;;  %v810_v5 = vld [vmem:[%s1065_s1 + $0x70] sm:$0xff]  ;;  %656 = vset.pattern.permute.xlu1 %v701_v3 }
   0x2   :  { %v68_v1 = vld [vmem:[%s1067_s3] sm:$0xff]  ;;  %104 = vmatpush.msra.mxu0 %v792_v0  ;;  %120 = vmatpush.msra.mxu1 %v804_v4  ;;  %v817_v6 = vld [vmem:[%s1065_s1 + $0x68] sm:$0xff] }
   0x3   :  { %v70_v2 = vld [vmem:[%s1068_s4] sm:$0xff]  ;;  %641 = vmatmul.msk.f32.vlgmr.msra.gmra.mxu0 %vm82_vm0, %v68_v1  ;;  %145 = vmatpush.msra.mxu2 %v804_v4 }
   0x4   :  { %74 = vperm.xlu0 %655, %v70_v2   ;;  %v822_v7 = vld [vmem:[%s1065_s1 + $0x60] sm:$0xff]  ;;  %657 = vset.pattern.permute.xlu2 %v701_v3 }
   0x5   :  { %121 = vmatpush.msra.mxu1 %v810_v5  ;;  %146 = vmatpush.msra.mxu2 %v810_v5 }
   0x6   :  { %360 = vmatpush.msrb.mxu0 %v804_v4 }
   0x7   :  { %20 = vsyncpa [#allocation4], 0  ;;  %v69_v8 = vld [vmem:[%s1067_s3 + $0x8] sm:$0xff]  ;;  %122 = vmatpush.msra.mxu1 %v817_v6  ;;  %147 = vmatpush.msra.mxu2 %v817_v6  ;;  %v838_v10 = vld [vmem:[%s1065_s1 + $0x58] sm:$0xff]  ;;  %s702_s30 = smov 122   ;;  %s704_s16 = smov 125  }
   0x8   :  { %v71_v9 = vld [vmem:[%s1068_s4 + $0x8] sm:$0xff]  ;;  %361 = vmatpush.msrb.mxu0 %v810_v5  ;;  %v847_v11 = vld [vmem:[%s1065_s1 + $0x50] sm:$0xff]  ;;  %v862_v13 = vld [vmem:[%s1065_s1 + $0x40] sm:$0xff]  ;;  %s706_s17 = smov 3   ;;  %s707_s18 = smov 9   ;;  %vm322_vm7 = vcmask 916480  }
   0x9   :  { %123 = vmatpush.msra.mxu1 %v822_v7  ;;  %148 = vmatpush.msra.mxu2 %v822_v7  ;;  %v854_v12 = vld [vmem:[%s1065_s1 + $0x48] sm:$0xff]  ;;  %v876_v14 = vld [vmem:[%s1065_s1 + $0x38] sm:$0xff]  ;;  %v881_v15 = vld [vmem:[%s1065_s1 + $0x30] sm:$0xff]  ;;  %vm513_vm14 = vcmask 130048   ;;  %s708_s25 = smov [#allocation3]   ;;  %s632_s27 = sshll.u32 %s1079_s15, 4  ;;  %s633_s27 = int_to_ptr.hbm [resolvable:$true] %s632_s27 }
   0xa   :  { %362 = vmatpush.msrb.mxu0 %v817_v6  ;;  %v888_v16 = vld [vmem:[%s1065_s1 + $0x28] sm:$0xff]  ;;  %v896_v17 = vld [vmem:[%s1065_s1 + $0x20] sm:$0xff]  ;;  %v908_v18 = vld [vmem:[%s1065_s1 + $0x18] sm:$0xff]  ;;  %s630_s0 = sshll.u32 %s708_s25, 4  ;;  %s631_s0 = int_to_ptr.vmem [resolvable:$true] %s630_s0 }
   0xb   :  { %642 = vmatmul.msk.f32.gmra.mxu0 %vm82_vm0, %v69_v8  ;;  %124 = vmatpush.msra.mxu1 %v838_v10  ;;  %v915_v19 = vld [vmem:[%s1065_s1 + $0x10] sm:$0xff]  ;;  %v923_v20 = vld [vmem:[%s1065_s1 + $0x8] sm:$0xff]  ;;  %v931_v21 = vld [vmem:[%s1065_s1] sm:$0xff] }
   0xc   :  { %79 = vperm.xlu0 %655, %v71_v9   ;;  %149 = vmatpush.msra.mxu2 %v838_v10  ;;  %v117_v58 = vld [vmem:[%s1073_s9 + $0x8] sm:$0xff]  ;;  %v116_v1 = vld [vmem:[%s1073_s9] sm:$0xff]  ;;  %s703_s9 = smov 119  }
   0xd   :  { %125 = vmatpush.msra.mxu1 %v847_v11  ;;  %363 = vmatpush.msrb.mxu0 %v822_v7  ;;  %v119_v63 = vld [vmem:[%s1074_s10 + $0x8] sm:$0xff] }
   0xe   :  { %150 = vmatpush.msra.mxu2 %v847_v11 }
   0xf   :  { %126 = vmatpush.msra.mxu1 %v854_v12  ;;  %364 = vmatpush.msrb.mxu0 %v838_v10 }
  0x10   :  { %151 = vmatpush.msra.mxu2 %v854_v12 }
  0x11   :  { %127 = vmatpush.msra.mxu1 %v862_v13  ;;  %365 = vmatpush.msrb.mxu0 %v847_v11 }
  0x12   :  { %152 = vmatpush.msra.mxu2 %v862_v13 }
  0x13   :  { %366 = vmatpush.msrb.mxu0 %v854_v12  ;;  %128 = vmatpush.msra.mxu1 %v876_v14 }
  0x14   :  { %153 = vmatpush.msra.mxu2 %v876_v14 }
  0x15   :  { %367 = vmatpush.msrb.mxu0 %v862_v13  ;;  %129 = vmatpush.msra.mxu1 %v881_v15 }
  0x16   :  { %154 = vmatpush.msra.mxu2 %v881_v15 }
  0x17   :  { %368 = vmatpush.msrb.mxu0 %v876_v14  ;;  %130 = vmatpush.msra.mxu1 %v888_v16 }
  0x18   :  { %155 = vmatpush.msra.mxu2 %v888_v16 }
  0x19   :  { %369 = vmatpush.msrb.mxu0 %v881_v15  ;;  %131 = vmatpush.msra.mxu1 %v896_v17 }
  0x1a   :  { %156 = vmatpush.msra.mxu2 %v896_v17 }
  0x1b   :  { %370 = vmatpush.msrb.mxu0 %v888_v16  ;;  %132 = vmatpush.msra.mxu1 %v908_v18 }
  0x1c   :  { %157 = vmatpush.msra.mxu2 %v908_v18 }
  0x1d   :  { %371 = vmatpush.msrb.mxu0 %v896_v17  ;;  %133 = vmatpush.msra.mxu1 %v915_v19 }
  0x1e   :  { %158 = vmatpush.msra.mxu2 %v915_v19 }
  0x1f   :  { %372 = vmatpush.msrb.mxu0 %v908_v18  ;;  %134 = vmatpush.msra.mxu1 %v923_v20 }
  0x20   :  { %159 = vmatpush.msra.mxu2 %v923_v20 }
  0x21   :  { %373 = vmatpush.msrb.mxu0 %v915_v19  ;;  %135 = vmatpush.msra.mxu1 %v931_v21 }
  0x22   :  { %160 = vmatpush.msra.mxu2 %v931_v21 }
  0x23   :  { %374 = vmatpush.msrb.mxu0 %v923_v20 }
  0x24   :  { %551 = vmatpush.msrb.mxu2 %v804_v4 }
  0x25   :  { %375 = vmatpush.msrb.mxu0 %v931_v21 }
  0x26   :  { %552 = vmatpush.msrb.mxu2 %v810_v5 }
  0x27   :  { %572 = vmatpush.msra.mxu0 %v804_v4 }
  0x28   :  { %553 = vmatpush.msrb.mxu2 %v817_v6 }
  0x29   :  { %573 = vmatpush.msra.mxu0 %v810_v5 }
  0x2a   :  { %554 = vmatpush.msrb.mxu2 %v822_v7 }
  0x2b   :  { %574 = vmatpush.msra.mxu0 %v817_v6 }
  0x2c   :  { %555 = vmatpush.msrb.mxu2 %v838_v10 }
  0x2d   :  { %575 = vmatpush.msra.mxu0 %v822_v7 }
  0x2e   :  { %556 = vmatpush.msrb.mxu2 %v847_v11 }
  0x2f   :  { %576 = vmatpush.msra.mxu0 %v838_v10 }
  0x30   :  { %557 = vmatpush.msrb.mxu2 %v854_v12 }
  0x31   :  { %577 = vmatpush.msra.mxu0 %v847_v11 }
  0x32   :  { %558 = vmatpush.msrb.mxu2 %v862_v13 }
  0x33   :  { %578 = vmatpush.msra.mxu0 %v854_v12 }
  0x34   :  { %559 = vmatpush.msrb.mxu2 %v876_v14 }
  0x35   :  { %579 = vmatpush.msra.mxu0 %v862_v13 }
  0x36   :  { %560 = vmatpush.msrb.mxu2 %v881_v15 }
  0x37   :  { %580 = vmatpush.msra.mxu0 %v876_v14 }
  0x38   :  { %561 = vmatpush.msrb.mxu2 %v888_v16 }
  0x39   :  { %581 = vmatpush.msra.mxu0 %v881_v15 }
  0x3a   :  { %562 = vmatpush.msrb.mxu2 %v896_v17 }
  0x3b   :  { %582 = vmatpush.msra.mxu0 %v888_v16 }
  0x3c   :  { %563 = vmatpush.msrb.mxu2 %v908_v18 }
  0x3d   :  { %583 = vmatpush.msra.mxu0 %v896_v17 }
  0x3e   :  { %564 = vmatpush.msrb.mxu2 %v915_v19 }
  0x3f   :  { %584 = vmatpush.msra.mxu0 %v908_v18 }
  0x40   :  { %565 = vmatpush.msrb.mxu2 %v923_v20 }
  0x41   :  { %585 = vmatpush.msra.mxu0 %v915_v19 }
  0x42   :  { %566 = vmatpush.msrb.mxu2 %v931_v21 }
  0x43   :  { %586 = vmatpush.msra.mxu0 %v923_v20 }
  0x45   :  { %587 = vmatpush.msra.mxu0 %v931_v21 }
  0x76   :  { %v75_v22 = vpop.permute.xlu0 %74 }
  0x7e   :  { %v80_v28 = vpop.permute.xlu0 %79 }
  0x80   :  { %v106_v23 = vpop.f32.mrf.mxu0 }
  0x81   :  { %v107_v24 = vadd.f32 %v106_v23, %v75_v22  ;;  %v118_v23 = vld [vmem:[%s1074_s10] sm:$0xff]  ;;  %s705_s10 = smov 6  }
  0x83   :  { %v112_v25 = vmul.f32 0.2, %v107_v24 }
  0x85   :  { %v967_v26 = vmax.f32 %v107_v24, %v112_v25 }
  0x87   :  { %136 = vmatmul.f32.vlgmr.msra.gmra.mxu1 %v967_v26  ;;  %v143_v27 = vmul.f32 %v967_v26, %v967_v26 }
  0x88   :  { %v109_v29 = vpop.f32.mrf.mxu0 }
  0x89   :  { %v110_v30 = vadd.f32 %v109_v29, %v80_v28  ;;  %161 = vmatmul.f32.vlgmr.msra.gmra.mxu2 %v143_v27 }
  0x8b   :  { %v113_v31 = vmul.f32 0.2, %v110_v30 }
  0x8d   :  { %v115_v32 = vmax.f32 %v110_v30, %v113_v31 }
  0x8f   :  { %139 = vmatmul.f32.gmra.mxu1 %v115_v32  ;;  %v144_v33 = vmul.f32 %v115_v32, %v115_v32 }
  0x91   :  { %164 = vmatmul.f32.gmra.mxu2 %v144_v33 }
 0x104   :  { %v137_v34 = vpop.f32.mrf.mxu1 }
 0x105   :  { %v168_v35 = vmul.f32 0.0078125, %v137_v34 }
 0x107   :  { %v172_v37 = vmul.f32 %v168_v35, %v168_v35 }
 0x10c   :  { %v162_v36 = vpop.f32.mrf.mxu2  ;;  %v140_v39 = vpop.f32.mrf.mxu1 }
 0x10d   :  { %v170_v38 = vmul.f32 0.0078125, %v162_v36  ;;  %v169_v41 = vmul.f32 0.0078125, %v140_v39  ;;  %v658_v39 = vld [vmem:[%s1066_s2 + $0x5] ss:$0 sm:$0xff] }
 0x10f   :  { %v174_v40 = vsub.f32 %v170_v38, %v172_v37  ;;  %v173_v44 = vmul.f32 %v169_v41, %v169_v41 }
 0x111   :  { %v176_v42 = vadd.f32 1e-05, %v174_v40 }
 0x113   :  { %665 = vrsqrt.f32 %v176_v42  ;;  %vm184_vm5 = vweird.f32 %v176_v42 }
 0x114   :  { %v165_v43 = vpop.f32.mrf.mxu2 }
 0x115   :  { %v171_v45 = vmul.f32 0.0078125, %v165_v43 }
 0x117   :  { %v175_v46 = vsub.f32 %v171_v45, %v173_v44 }
 0x119   :  { %v666_v47 = vpop.eup %665  ;;  %v177_v48 = vadd.f32 1e-05, %v175_v46  ;;  %v659_v46 = vld [vmem:[%s1066_s2 + $0x4] ss:$0 sm:$0xff] }
 0x11a   :  { %v179_v49 = vmul.f32 %v666_v47, %v176_v42  ;;  %vm185_vm3 = vweird.f32 %v666_v47 }
 0x11b   :  { %667 = vrsqrt.f32 %v177_v48  ;;  %vm194_vm2 = vweird.f32 %v177_v48  ;;  %vm186_vm6 = vmor %vm184_vm5, %vm185_vm3 }
 0x11c   :  { %v180_v50 = vmul.f32 %v666_v47, %v179_v49  ;;  %v664_v49 = vld [vmem:[%s1066_s2 + $0x3] ss:$0 sm:$0xff] }
 0x11e   :  { %v181_v52 = vmul.f32 0.5, %v180_v50 }
 0x120   :  { %v182_v55 = vsub.f32 1.5, %v181_v52  ;;  %v663_v52 = vld [vmem:[%s1066_s2 + $0x2] ss:$0 sm:$0xff] }
 0x121   :  { %v668_v51 = vpop.eup %667 }
 0x122   :  { %v189_v53 = vmul.f32 %v668_v51, %v177_v48  ;;  %vm195_vm1 = vweird.f32 %v668_v51  ;;  %v183_v60 = vmul.f32 %v666_v47, %v182_v55 }
 0x123   :  { %vm196_vm4 = vmor %vm194_vm2, %vm195_vm1 }
 0x124   :  { %v190_v54 = vmul.f32 %v668_v51, %v189_v53  ;;  %v187_v2 = vsel %vm186_vm6, %v666_v47, %v183_v60 }
 0x125   :  { %v198_v9 = vmul.f32 %v187_v2, %v116_v1 }
 0x126   :  { %v191_v56 = vmul.f32 0.5, %v190_v54 }
 0x127   :  { %v200_v22 = vmul.f32 %v198_v9, %v168_v35  ;;  %v662_v35 = vld [vmem:[%s1066_s2 + $0x6] ss:$0 sm:$0xff] }
 0x128   :  { %v192_v57 = vsub.f32 1.5, %v191_v56 }
 0x129   :  { %v202_v24 = vsub.f32 %v118_v23, %v200_v22  ;;  %v295_v22 = vld [vmem:[%s1069_s5 + $0x8] sm:$0xff] }
 0x12a   :  { %v193_v59 = vmul.f32 %v668_v51, %v192_v57  ;;  %v660_v57 = vld [vmem:[%s1066_s2 + $0x1] ss:$0 sm:$0xff] }
 0x12c   :  { %v197_v61 = vsel %vm196_vm4, %v668_v51, %v193_v59 }
 0x12d   :  { %v199_v62 = vmul.f32 %v197_v61, %v117_v58 }
 0x12f   :  { %211 = vperm.xlu1 %656, %v199_v62   ;;  %v201_v3 = vmul.f32 %v199_v62, %v169_v41  ;;  %v661_v62 = vld [vmem:[%s1066_s2] ss:$0 sm:$0xff] }
 0x131   :  { %v203_v8 = vsub.f32 %v119_v63, %v201_v3 }
 0x133   :  { %223 = vperm.xlu2 %657, %v203_v8  }
 0x137   :  { %206 = vperm.xlu1 %656, %v198_v9   ;;  %v294_v9 = vld [vmem:[%s1069_s5] sm:$0xff] }
 0x13b   :  { %218 = vperm.xlu2 %657, %v202_v24  }
 0x18d   :  { %v224_v25 = vpop.permute.xlu2 %223 }
 0x195   :  { %v219_v33 = vpop.permute.xlu2 %218 }
 0x1a1   :  { %v212_v27 = vpop.permute.xlu1 %211 }
 0x1a2   :  { %v215_v28 = vmul.f32 %v212_v27, %v115_v32  ;;  %v310_v32 = vld [vmem:[%s1070_s6] sm:$0xff] }
 0x1a4   :  { %v227_v29 = vadd.f32 %v224_v25, %v215_v28 }
 0x1a6   :  { %276 = vrot.lane.b32.xlu2 %v227_v29, %s702_s30  ;;  %286 = vrot.lane.b32.xlu0 %v227_v29, %s703_s9  ;;  %v261_v53 = vmul.f32 %v664_v49, %v227_v29 }
 0x1a9   :  { %v207_v30 = vpop.permute.xlu1 %206 }
 0x1aa   :  { %v214_v31 = vmul.f32 %v207_v30, %v967_v26  ;;  %v311_v26 = vld [vmem:[%s1070_s6 + $0x8] sm:$0xff] }
 0x1ac   :  { %v226_v34 = vadd.f32 %v219_v33, %v214_v31 }
 0x1ae   :  { %264 = vrot.lane.b32.xlu2 %v226_v34, %s704_s16  ;;  %274 = vrot.lane.b32.xlu0 %v226_v34, %s702_s30  ;;  %v260_v55 = vmul.f32 %v664_v49, %v226_v34 }
 0x1af   :  { %284 = vrot.lane.b32.xlu1 %v226_v34, %s703_s9 }
 0x1b6   :  { %240 = vrot.lane.b32.xlu2 %v227_v29, %s705_s10  ;;  %250 = vrot.lane.b32.xlu0 %v227_v29, %s706_s17 }
 0x1b7   :  { %266 = vrot.lane.b32.xlu1 %v227_v29, %s704_s16 }
 0x1be   :  { %228 = vrot.lane.b32.xlu2 %v226_v34, %s707_s18  ;;  %238 = vrot.lane.b32.xlu0 %v226_v34, %s705_s10 }
 0x1bf   :  { %248 = vrot.lane.b32.xlu1 %v226_v34, %s706_s17 }
 0x1c6   :  { %314 = vperm.xlu0 %655, %v310_v32  }
 0x1c7   :  { %230 = vrot.lane.b32.xlu1 %v227_v29, %s707_s18 }
 0x1cf   :  { %319 = vperm.xlu1 %656, %v311_v26  }
 0x200   :  { %v277_v38 = vpop.permute.xlu2 %276 }
 0x201   :  { %v281_v43 = vmul.f32 %v658_v39, %v277_v38 }
 0x208   :  { %v265_v44 = vpop.permute.xlu2 %264 }
 0x209   :  { %v270_v51 = vmul.f32 %v659_v46, %v265_v44 }
 0x210   :  { %v241_v54 = vpop.permute.xlu2 %240 }
 0x211   :  { %v245_v61 = vmul.f32 %v660_v57, %v241_v54  ;;  %v359_v54 = vld [vmem:[%s1076_s12 + $0x8] sm:$0xff] }
 0x218   :  { %v287_v36 = vpop.permute.xlu0 %286  ;;  %v229_v1 = vpop.permute.xlu2 %228 }
 0x219   :  { %v291_v37 = vmul.f32 %v662_v35, %v287_v36  ;;  %v234_v8 = vmul.f32 %v661_v62, %v229_v1 }
 0x21b   :  { %331 = vmatpush.msra.mxu3 %v291_v37 }
 0x220   :  { %v275_v40 = vpop.permute.xlu0 %274 }
 0x221   :  { %v285_v41 = vpop.permute.xlu1 %284  ;;  %v280_v45 = vmul.f32 %v658_v39, %v275_v40  ;;  %v356_v40 = vld [vmem:[%s1075_s11] sm:$0xff] }
 0x222   :  { %v290_v42 = vmul.f32 %v662_v35, %v285_v41 }
 0x224   :  { %332 = vmatpush.msra.mxu3 %v290_v42 }
 0x226   :  { %333 = vmatpush.msra.mxu3 %v281_v43 }
 0x228   :  { %334 = vmatpush.msra.mxu3 %v280_v45  ;;  %v251_v50 = vpop.permute.xlu0 %250 }
 0x229   :  { %v267_v47 = vpop.permute.xlu1 %266  ;;  %v255_v58 = vmul.f32 %v663_v52, %v251_v50 }
 0x22a   :  { %v271_v48 = vmul.f32 %v659_v46, %v267_v47  ;;  %v358_v46 = vld [vmem:[%s1076_s12] sm:$0xff] }
 0x22c   :  { %335 = vmatpush.msra.mxu3 %v271_v48 }
 0x22e   :  { %336 = vmatpush.msra.mxu3 %v270_v51  ;;  %v357_v51 = vld [vmem:[%s1075_s11 + $0x8] sm:$0xff] }
 0x230   :  { %337 = vmatpush.msra.mxu3 %v261_v53  ;;  %v239_v60 = vpop.permute.xlu0 %238 }
 0x231   :  { %v249_v56 = vpop.permute.xlu1 %248  ;;  %v244_v63 = vmul.f32 %v660_v57, %v239_v60 }
 0x232   :  { %338 = vmatpush.msra.mxu3 %v260_v55  ;;  %v254_v59 = vmul.f32 %v663_v52, %v249_v56 }
 0x234   :  { %339 = vmatpush.msra.mxu3 %v255_v58 }
 0x236   :  { %340 = vmatpush.msra.mxu3 %v254_v59  ;;  %v508_v59 = vld [vmem:[%s1071_s7] sm:$0xff] }
 0x238   :  { %341 = vmatpush.msra.mxu3 %v245_v61 }
 0x239   :  { %v231_v2 = vpop.permute.xlu1 %230 }
 0x23a   :  { %v235_v3 = vmul.f32 %v661_v62, %v231_v2  ;;  %342 = vmatpush.msra.mxu3 %v244_v63  ;;  %v517_v2 = vld [vmem:[%s1072_s8] sm:$0xff] }
 0x23c   :  { %343 = vmatpush.msra.mxu3 %v235_v3 }
 0x23e   :  { %344 = vmatpush.msra.mxu3 %v234_v8 }
 0x23f   :  { %643 = vmatmul.msk.f32.vlgmr.msra.gmra.mxu3 %vm322_vm7, %v294_v9 }
 0x240   :  { %385 = vmatpush.msrb.mxu3 %v804_v4  ;;  %v315_v4 = vpop.permute.xlu0 %314 }
 0x242   :  { %386 = vmatpush.msrb.mxu3 %v810_v5 }
 0x244   :  { %387 = vmatpush.msrb.mxu3 %v817_v6 }
 0x246   :  { %388 = vmatpush.msrb.mxu3 %v822_v7 }
 0x247   :  { %644 = vmatmul.msk.f32.gmra.mxu3 %vm322_vm7, %v295_v22 }
 0x248   :  { %389 = vmatpush.msrb.mxu3 %v838_v10 }
 0x24a   :  { %390 = vmatpush.msrb.mxu3 %v847_v11 }
 0x24c   :  { %391 = vmatpush.msrb.mxu3 %v854_v12  ;;  %v320_v12 = vpop.permute.xlu1 %319 }
 0x24e   :  { %392 = vmatpush.msrb.mxu3 %v862_v13 }
 0x250   :  { %393 = vmatpush.msrb.mxu3 %v876_v14 }
 0x252   :  { %394 = vmatpush.msrb.mxu3 %v881_v15 }
 0x254   :  { %395 = vmatpush.msrb.mxu3 %v888_v16 }
 0x256   :  { %396 = vmatpush.msrb.mxu3 %v896_v17 }
 0x258   :  { %397 = vmatpush.msrb.mxu3 %v908_v18 }
 0x25a   :  { %398 = vmatpush.msrb.mxu3 %v915_v19 }
 0x25c   :  { %399 = vmatpush.msrb.mxu3 %v923_v20 }
 0x25e   :  { %400 = vmatpush.msrb.mxu3 %v931_v21 }
 0x2c2   :  { %v346_v5 = vpop.f32.mrf.mxu3 }
 0x2c3   :  { %v347_v6 = vadd.f32 %v346_v5, %v315_v4 }
 0x2c5   :  { %v352_v7 = vmul.f32 0.2, %v347_v6 }
 0x2c7   :  { %v354_v10 = vmax.f32 %v347_v6, %v352_v7 }
 0x2c9   :  { %376 = vmatmul.f32.vlgmr.msrb.gmra.mxu0 %v354_v10  ;;  %v383_v11 = vmul.f32 %v354_v10, %v354_v10 }
 0x2ca   :  { %v349_v13 = vpop.f32.mrf.mxu3 }
 0x2cb   :  { %v350_v14 = vadd.f32 %v349_v13, %v320_v12  ;;  %401 = vmatmul.f32.vlgmr.msrb.gmra.mxu3 %v383_v11 }
 0x2cd   :  { %v353_v15 = vmul.f32 0.2, %v350_v14 }
 0x2cf   :  { %v355_v16 = vmax.f32 %v350_v14, %v353_v15 }
 0x2d1   :  { %379 = vmatmul.f32.gmra.mxu0 %v355_v16  ;;  %541 = vmatpush.msrb.mxu1 %v355_v16  ;;  %v384_v17 = vmul.f32 %v355_v16, %v355_v16 }
 0x2d3   :  { %404 = vmatmul.f32.gmra.mxu3 %v384_v17  ;;  %542 = vmatpush.msrb.mxu1 %v354_v10 }
 0x346   :  { %v377_v18 = vpop.f32.mrf.mxu0 }
 0x347   :  { %v408_v19 = vmul.f32 0.0078125, %v377_v18 }
 0x349   :  { %v412_v21 = vmul.f32 %v408_v19, %v408_v19 }
 0x34e   :  { %v402_v20 = vpop.f32.mrf.mxu3  ;;  %v380_v24 = vpop.f32.mrf.mxu0 }
 0x34f   :  { %v410_v23 = vmul.f32 0.0078125, %v402_v20  ;;  %v409_v27 = vmul.f32 0.0078125, %v380_v24 }
 0x351   :  { %v414_v25 = vsub.f32 %v410_v23, %v412_v21  ;;  %v413_v30 = vmul.f32 %v409_v27, %v409_v27  ;;  %v549_v23 = vld [vmem:[%s1077_s13] sm:$0xff] }
 0x353   :  { %v416_v28 = vadd.f32 1e-05, %v414_v25 }
 0x355   :  { %669 = vrsqrt.f32 %v416_v28  ;;  %vm424_vm9 = vweird.f32 %v416_v28 }
 0x356   :  { %v405_v29 = vpop.f32.mrf.mxu3 }
 0x357   :  { %v411_v31 = vmul.f32 0.0078125, %v405_v29 }
 0x359   :  { %v415_v33 = vsub.f32 %v411_v31, %v413_v30 }
 0x35b   :  { %v670_v34 = vpop.eup %669  ;;  %v417_v32 = vadd.f32 1e-05, %v415_v33 }
 0x35c   :  { %v419_v26 = vmul.f32 %v670_v34, %v416_v28  ;;  %vm425_vm8 = vweird.f32 %v670_v34  ;;  %v550_v28 = vld [vmem:[%s1078_s14] sm:$0xff] }
 0x35d   :  { %671 = vrsqrt.f32 %v417_v32  ;;  %vm426_vm10 = vmor %vm424_vm9, %vm425_vm8  ;;  %vm434_vm12 = vweird.f32 %v417_v32 }
 0x35e   :  { %v420_v35 = vmul.f32 %v670_v34, %v419_v26 }
 0x360   :  { %v421_v36 = vmul.f32 0.5, %v420_v35 }
 0x362   :  { %v422_v37 = vsub.f32 1.5, %v421_v36 }
 0x363   :  { %v672_v38 = vpop.eup %671 }
 0x364   :  { %v429_v39 = vmul.f32 %v672_v38, %v417_v32  ;;  %v423_v41 = vmul.f32 %v670_v34, %v422_v37  ;;  %vm435_vm11 = vweird.f32 %v672_v38 }
 0x365   :  { %vm436_vm13 = vmor %vm434_vm12, %vm435_vm11 }
 0x366   :  { %v430_v42 = vmul.f32 %v672_v38, %v429_v39  ;;  %v427_v43 = vsel %vm426_vm10, %v670_v34, %v423_v41 }
 0x367   :  { %v438_v44 = vmul.f32 %v427_v43, %v356_v40 }
 0x368   :  { %v431_v45 = vmul.f32 0.5, %v430_v42 }
 0x369   :  { %444 = vxpose.xlu2.b32.start [1/2] (short) (narrow) %v438_v44, 8  ;;  %v440_v47 = vmul.f32 %v438_v44, %v408_v19 }
 0x36a   :  { %v432_v48 = vsub.f32 1.5, %v431_v45 }
 0x36b   :  { %v442_v49 = vsub.f32 %v358_v46, %v440_v47 }
 0x36c   :  { %v433_v50 = vmul.f32 %v672_v38, %v432_v48 }
 0x36d   :  { %476 = vxpose.xlu0.b32.start [1/2] (short) (narrow) %v442_v49, 8 }
 0x36e   :  { %v437_v52 = vsel %vm436_vm13, %v672_v38, %v433_v50 }
 0x36f   :  { %v439_v53 = vmul.f32 %v437_v52, %v357_v51 }
 0x371   :  { %445 = vxpose.xlu2.b32.end [2/2] (short) (narrow) %v439_v53, 8  ;;  %v441_v55 = vmul.f32 %v439_v53, %v409_v27 }
 0x373   :  { %v443_v56 = vsub.f32 %v359_v54, %v441_v55 }
 0x375   :  { %477 = vxpose.xlu0.b32.end [2/2] (short) (narrow) %v443_v56, 8 }
 0x402   :  { %v460_v57 = vpop.trf.xlu2 }
 0x403   :  { %v509_v58 = vperm.slane %v460_v57, 0 }
 0x405   :  { %v510_v60 = vmul.f32 %v509_v58, %v508_v59 }
 0x407   :  { %645 = vmatmul.msk.f32.vlgmr.msrb.gmra.mxu1 %vm513_vm14, %v510_v60 }
 0x411   :  { %v492_v61 = vpop.trf.xlu0 }
 0x412   :  { %v511_v62 = vperm.slane %v492_v61, 0 }
 0x414   :  { %v512_v63 = vmul.f32 %v511_v62, %v508_v59 }
 0x416   :  { %v514_v1 = vsel %vm513_vm14, %v512_v63, 0.0 }
 0x417   :  { %515 = vadd.xlane.f32.xlu1 %v514_v1 }
 0x484   :  { %v544_v9 = vpop.f32.mrf.mxu1 }
 0x48a   :  { %v516_v3 = vpop.xlane.xlu1 %515 }
 0x48b   :  { %v518_v8 = vadd.f32 %v517_v2, %v516_v3 }
 0x48d   :  { %521 = vperm.xlu2 %657, %v518_v8  }
 0x4e7   :  { %v522_v22 = vpop.permute.xlu2 %521 }
 0x4e8   :  { %v545_v4 = vadd.f32 %v544_v9, %v522_v22 }
 0x4ea   :  { %v547_v5 = vmul.f32 0.2, %v545_v4 }
 0x4ec   :  { %v548_v6 = vmax.f32 %v545_v4, %v547_v5 }
 0x4ee   :  { %v571_v7 = vmul.f32 %v548_v6, %v548_v6  ;;  %567 = vmatmul.f32.vlgmr.msrb.gmra.mxu2 %v548_v6 }
 0x4f0   :  { %588 = vmatmul.f32.vlgmr.msra.gmra.mxu0 %v571_v7 }
 0x56d   :  { %v589_v10 = vpop.f32.mrf.mxu0 }
 0x56e   :  { %v593_v13 = vmul.f32 0.0078125, %v589_v10 }
 0x571   :  { %v568_v11 = vpop.f32.mrf.mxu2 }
 0x572   :  { %v592_v12 = vmul.f32 0.0078125, %v568_v11 }
 0x574   :  { %v594_v14 = vmul.f32 %v592_v12, %v592_v12 }
 0x576   :  { %v595_v15 = vsub.f32 %v593_v13, %v594_v14 }
 0x578   :  { %v596_v16 = vadd.f32 1e-05, %v595_v15 }
 0x57a   :  { %673 = vrsqrt.f32 %v596_v16  ;;  %vm603_vm0 = vweird.f32 %v596_v16 }
 0x580   :  { %v674_v17 = vpop.eup %673 }
 0x581   :  { %v598_v18 = vmul.f32 %v674_v17, %v596_v16  ;;  %vm604_vm15 = vweird.f32 %v674_v17 }
 0x582   :  { %vm605_vm1 = vmor %vm603_vm0, %vm604_vm15 }
 0x583   :  { %v599_v19 = vmul.f32 %v674_v17, %v598_v18 }
 0x585   :  { %v600_v20 = vmul.f32 0.5, %v599_v19 }
 0x587   :  { %v601_v21 = vsub.f32 1.5, %v600_v20 }
 0x589   :  { %v602_v24 = vmul.f32 %v674_v17, %v601_v21 }
 0x58b   :  { %v606_v25 = vsel %vm605_vm1, %v674_v17, %v602_v24 }
 0x58c   :  { %v607_v27 = vmul.f32 %v606_v25, %v549_v23 }
 0x58e   :  { %v608_v29 = vmul.f32 %v607_v27, %v592_v12  ;;  %612 = vperm.xlu0 %655, %v607_v27  }
 0x590   :  { %v609_v30 = vsub.f32 %v550_v28, %v608_v29 }
 0x592   :  { %618 = vperm.xlu1 %656, %v609_v30  }
 0x600   :  { %v613_v31 = vpop.permute.xlu0 %612 }
 0x601   :  { %v615_v33 = vmul.f32 %v613_v31, %v548_v6 }
 0x604   :  { %v619_v34 = vpop.permute.xlu1 %618 }
 0x605   :  { %v621_v32 = vadd.f32 %v619_v34, %v615_v33 }
 0x607   :  { %v622_v26 = vadd.f32 %v621_v32, %v792_v0 }
 0x609   :  { %v623_v35 = vmax.f32 %v622_v26, 0.0 }
 0x60b   :  { %624 = vst [vmem:[#allocation3] sm:$0xff] %v623_v35 }
 0x60c   :  { %635 = dma.vmem_to_hbm [thread:$0]  %s631_s0, 128, %s633_s27, [#allocation4]  }
 0x60d   :  { %699 = dma.done.wait [#allocation4], 128  }
 0x60e   :  { %700 = vsyncadd [#allocation4], 4294967168 }
 0x60f   :  { %640 = vsyncpa [#allocation4], 1 }

</bundles_post_ra>
